<compile_context>
chip_gen: v6e
topology: v6e:2x2x1
jax: 0.10.0
libtpu: 0.0.40
codegen_flags: <defaults>
</compile_context>

<pallas_src>
import functools
import math

import jax
import jax.numpy as jnp
from jax.experimental import pallas as pl
from jax.experimental.pallas import tpu as pltpu


# ----------------------------------------------------------------------------
# Parameter / buffer construction (glue, plain JAX — deterministic)
# ----------------------------------------------------------------------------
def make_gauss_encoding_params(d_model: int, max_len: int = 300):
    # sinusoidal positional encoding, identical to the torch code
    position = jnp.arange(max_len, dtype=jnp.float32)[:, None]               # (max_len, 1)
    div_term = jnp.exp(
        jnp.arange(0, d_model, 2, dtype=jnp.float32) * (-math.log(10000.0) / d_model)
    )                                                                        # (ceil(d/2),)
    pe = jnp.zeros((max_len, d_model), dtype=jnp.float32)
    pe = pe.at[:, 0::2].set(jnp.sin(position * div_term))
    if d_model % 2 == 1:
        pe = pe.at[:, 1::2].set(jnp.cos(position * div_term)[:, : div_term.shape[0] - 1])
    else:
        pe = pe.at[:, 1::2].set(jnp.cos(position * div_term))
    pe = pe[:, None, :]                                                      # (max_len, 1, d_model)

    # un-normalized Gaussian kernel, identical to GaussEncoding.gauss()
    k = int(math.sqrt(d_model))
    sigma = int(k / 2)
    center = k // 2
    coords = jnp.arange(k, dtype=jnp.float32) - center
    g = jnp.exp(-(coords[:, None] ** 2 + coords[None, :] ** 2) / (2.0 * float(sigma ** 2)))
    gauss_kernel = g.reshape(-1, d_model).astype(jnp.float32)                # (1, d_model)
    return pe, gauss_kernel


# ----------------------------------------------------------------------------
# Pallas kernel: fused (x + pe_g) followed by cheap hash-based dropout
# ----------------------------------------------------------------------------
def _gauss_encoding_kernel(seed_ref, x_ref, pe_g_ref, o_ref, *,
                           keep_prob: float, apply_dropout: bool, r_tile: int):
    # (r_tile, L*D) elementwise hot path; (1, L*D) pe*gauss broadcasts over rows
    val = x_ref[...].astype(jnp.float32) + pe_g_ref[...]

    if apply_dropout:
        shape = val.shape
        seed = seed_ref[0].astype(jnp.uint32)
        row0 = (pl.program_id(0) * r_tile).astype(jnp.uint32)
        # global element coordinates -> counter-based hash (independent of tiling)
        rows = jax.lax.broadcasted_iota(jnp.int32, shape, 0).astype(jnp.uint32) + row0
        cols = jax.lax.broadcasted_iota(jnp.int32, shape, 1).astype(jnp.uint32)
        h = rows * jnp.uint32(0x9E3779B1) + cols * jnp.uint32(0x85EBCA77)
        h = h ^ (seed * jnp.uint32(0x27D4EB2F) + jnp.uint32(0x165667B1))
        # murmur3 fmix32-style avalanche
        h = h ^ (h >> jnp.uint32(16))
        h = h * jnp.uint32(0x7FEB352D)
        h = h ^ (h >> jnp.uint32(15))
        h = h * jnp.uint32(0x846CA68B)
        h = h ^ (h >> jnp.uint32(16))
        # integer threshold compare (31-bit, sign-safe) + single select/mul
        thr = jnp.int32(min(int(keep_prob * float(1 << 31)), (1 << 31) - 1))
        keep = (h >> jnp.uint32(1)).astype(jnp.int32) < thr
        val = val * jnp.where(keep,
                              jnp.float32(1.0 / keep_prob),
                              jnp.float32(0.0))

    o_ref[...] = val.astype(o_ref.dtype)


def gauss_encoding_forward(x, pe, gauss_kernel, *, dropout_p: float = 0.1,
                           seed: int = 0, apply_dropout: bool = True):
    B, C, L, D = x.shape
    R = B * C
    LD = L * D

    # fold the tiny x-independent constant once, lane-dense (1, L*D)
    pe_g = (pe[:L, 0, :] * gauss_kernel).reshape(1, LD).astype(jnp.float32)
    x2 = x.reshape(R, LD)

    # large row tiles; either the full row extent or a multiple of 8
    r_tile = R if R <= 512 else 512
    grid = (pl.cdiv(R, r_tile),)

    keep_prob = 1.0 - float(dropout_p)
    do_dropout = apply_dropout and dropout_p > 0.0

    kernel = functools.partial(_gauss_encoding_kernel,
                               keep_prob=keep_prob,
                               apply_dropout=do_dropout,
                               r_tile=r_tile)
    seed_arr = jnp.asarray([seed], dtype=jnp.int32)

    out = pl.pallas_call(
        kernel,
        out_shape=jax.ShapeDtypeStruct((R, LD), x.dtype),
        grid_spec=pltpu.PrefetchScalarGridSpec(
            num_scalar_prefetch=1,                 # seed lands in SMEM
            grid=grid,
            in_specs=[
                pl.BlockSpec((r_tile, LD), lambda i, seed: (i, 0)),  # x rows
                pl.BlockSpec((1, LD),      lambda i, seed: (0, 0)),  # pe*gauss (VMEM-resident)
            ],
            out_specs=pl.BlockSpec((r_tile, LD), lambda i, seed: (i, 0)),
        ),
        compiler_params=pltpu.CompilerParams(
            dimension_semantics=("parallel",)),    # rows independent -> megacore/2-TC
    )(seed_arr, x2, pe_g)

    return out.reshape(B, C, L, D)


# ----------------------------------------------------------------------------
# Driver
# ----------------------------------------------------------------------------
if __name__ == "__main__":
    d_model = 16        # must be a perfect square (torch reshape requirement)
    B, C, L = 2, 4, 16  # x.size(2) == L == 16
    dropout_p = 0.1

    pe, gauss_kernel = make_gauss_encoding_params(d_model, max_len=300)

    key = jax.random.PRNGKey(0)
    x = jax.random.normal(key, (B, C, L, d_model), dtype=jnp.float32)

    # 1) deterministic-part correctness check (dropout disabled)
    out_nodrop = gauss_encoding_forward(x, pe, gauss_kernel,
                                        dropout_p=dropout_p, apply_dropout=False)
    out_nodrop = jax.block_until_ready(out_nodrop)
    ref = x + pe[:L, 0, :] * gauss_kernel
    assert out_nodrop.shape == x.shape and out_nodrop.dtype == x.dtype
    assert jnp.allclose(out_nodrop, ref, atol=1e-6, rtol=1e-6), "mismatch vs reference"

    # 2) full forward (with in-kernel dropout, deterministic seed)
    out = gauss_encoding_forward(x, pe, gauss_kernel,
                                 dropout_p=dropout_p, seed=123, apply_dropout=True)
    out = jax.block_until_ready(out)
    assert out.shape == x.shape and out.dtype == x.dtype
    # sanity: dropped elements are exactly zero, kept elements scaled by 1/(1-p)
    zero_frac = float(jnp.mean((out == 0.0).astype(jnp.float32)))
    assert 0.0 <= zero_frac <= 0.6, f"implausible dropout zero fraction {zero_frac}"

    print("KERNEL_OK")
</pallas_src>

<mosaic_0001>
module attributes {stable_mosaic.version = 11 : i64} {
  func.func @_gauss_encoding_kernel(%arg0: i32, %arg1: memref<1xi32, #tpu.memory_space<smem>>, %arg2: memref<8x256xf32, #tpu.memory_space<vmem>>, %arg3: memref<1x256xf32, #tpu.memory_space<vmem>>, %arg4: memref<8x256xf32, #tpu.memory_space<vmem>>) attributes {dimension_semantics = [#tpu.dimension_semantics<parallel>], iteration_bounds = array<i64: 1>, scalar_prefetch = 1 : i64, scratch_operands = 0 : i64, tpu.core_type = #tpu.core_type<tc>, window_params = [{transform_indices = @transform_0, window_bounds = array<i64: 8, 256>}, {pipeline_mode = #tpu.pipeline_mode<synchronous>, transform_indices = @transform_1, window_bounds = array<i64: 1, 256>}, {transform_indices = @transform_2, window_bounds = array<i64: 8, 256>}]} {
    %c0 = arith.constant 0 : index
    %c0_0 = arith.constant 0 : index
    %0 = vector.load %arg2[%c0, %c0_0] : memref<8x256xf32, #tpu.memory_space<vmem>>, vector<8x256xf32>
    %c0_1 = arith.constant 0 : index
    %c0_2 = arith.constant 0 : index
    %1 = vector.load %arg3[%c0_1, %c0_2] : memref<1x256xf32, #tpu.memory_space<vmem>>, vector<1x256xf32>
    %2 = vector.broadcast %1 : vector<1x256xf32> to vector<8x256xf32>
    %3 = arith.addf %0, %2 : vector<8x256xf32>
    %c0_3 = arith.constant 0 : index
    %c0_4 = arith.constant 0 : index
    %4 = vector.load %arg4[%c0_3, %c0_4] : memref<8x256xf32, #tpu.memory_space<vmem>>, vector<8x256xf32>
    tpu.vector_store %arg4[%c0_3, %c0_4], %3 {strides = array<i32>} : memref<8x256xf32, #tpu.memory_space<vmem>>, vector<8x256xf32>,
    return
  }
  func.func @transform_0(%arg0: i32, %arg1: memref<1xi32, #tpu.memory_space<smem>>) -> (i32, i32) {
    %c0_i32 = arith.constant 0 : i32
    %c0_i32_0 = arith.constant 0 : i32
    return %arg0, %c0_i32 : i32, i32
  }
  func.func @transform_1(%arg0: i32, %arg1: memref<1xi32, #tpu.memory_space<smem>>) -> (i32, i32) {
    %c0_i32 = arith.constant 0 : i32
    %c0_i32_0 = arith.constant 0 : i32
    %c0_i32_1 = arith.constant 0 : i32
    return %c0_i32, %c0_i32_0 : i32, i32
  }
  func.func @transform_2(%arg0: i32, %arg1: memref<1xi32, #tpu.memory_space<smem>>) -> (i32, i32) {
    %c0_i32 = arith.constant 0 : i32
    %c0_i32_0 = arith.constant 0 : i32
    return %arg0, %c0_i32 : i32, i32
  }
}

</mosaic_0001>

<bundles_post_ra>
// kernel: tpu_custom_call.1
= control target key start
LH: loop header
LB: loop body
LE: loop exit
PB: predicated region body
PF: predicated region fallthrough
CT: control target
= control target key end

     0   :  { %9 = vsyncpa [#allocation5], 0  ;;  %s136_s0 = inlined_call_operand.<no memory space> [shape: s32[1], index: 0, kind: input, shape index: {}]   ;;  %s137_s1 = inlined_call_operand.hbm [shape: f32[8,256], index: 1, kind: input, shape index: {}]   ;;  %s138_s2 = inlined_call_operand.vmem [shape: f32[1,256], index: 2, kind: input, shape index: {}]   ;;  %s139_s3 = inlined_call_operand.hbm [shape: f32[8,256], index: 3, kind: output, shape index: {}]  }
   0x1   :  { %10 = vsyncpa [#allocation6], 0  ;;  %s105_s12 = smov [#allocation4]  }
   0x2   :  { %s17_s13 = sshll.u32 %s105_s12, 4  ;;  %s18_s13 = int_to_ptr.vmem [resolvable:$true] %s17_s13 }
   0x3   :  { %s69_s14 = scalar_lea.vmem %s18_s13, 256  ;;  %p74_p1 = scmp.lt.s32.totalorder %s18_s13, %s18_s13 }
   0x4   :  { %p70_p0 = scmp.ne.s32.totalorder %s18_s13, %s69_s14  ;;  %p75_p2 = scmp.lt.s32.totalorder %s69_s14, %s69_s14 }
   0x6   :  { %p76_p3 = por %p75_p2, %p74_p1 }
   0x8   :  { %p77_p4 = pnand %p76_p3, %p70_p0 }
   0xa   :  { %80 = shalt.err (!%p77_p4)
}
   0xb   :  { %20 = dma.hbm_to_vmem [thread:$0]  %s137_s1, 256, %s18_s13, [#allocation5]  }
   0xc   :  { %101 = dma.done.wait [#allocation5], 256  }
   0xd   :  { %102 = vsyncadd [#allocation5], 4294967040  ;;  %v30_v0 = vlaneseq  ;;  %v26_v4 = vld [vmem:[#allocation4] sm:$0xff]  ;;  %v27_v6 = vld [vmem:[#allocation4 + $0x8] sm:$0xff]  ;;  %s106_s18 = smov [#allocation7]  }
   0xe   :  { %v28_v5 = vld [vmem:[%s138_s2] sm:$0x3]  ;;  %s50_s19 = sshll.u32 %s106_s18, 4  ;;  %s51_s19 = int_to_ptr.vmem [resolvable:$true] %s50_s19 }
   0xf   :  { %v31_v1 = vshrl.u32 %v30_v0, 7  ;;  %s81_s1 = scalar_lea.vmem %s51_s19, 256  ;;  %p86_p6 = scmp.lt.s32.totalorder %s51_s19, %s51_s19 }
  0x10   :  { %p82_p5 = scmp.ne.s32.totalorder %s51_s19, %s81_s1  ;;  %p87_p7 = scmp.lt.s32.totalorder %s81_s1, %s81_s1 }
  0x11   :  { %v32_v2 = vsub.s32 0, %v31_v1  ;;  %v36_v3 = vsub.s32 1, %v31_v1 }
  0x12   :  { %p88_p8 = por %p87_p7, %p86_p6 }
  0x13   :  { %v33_v7 = vrot.slane %v28_v5, %v32_v2  ;;  %v37_v8 = vrot.slane %v28_v5, %v36_v3 }
  0x14   :  { %p89_p9 = pnand %p88_p8, %p82_p5 }
  0x15   :  { %v40_v9 = vadd.f32 %v33_v7, %v26_v4  ;;  %v41_v10 = vadd.f32 %v37_v8, %v27_v6 }
  0x17   :  { %42 = vst [vmem:[#allocation7] sm:$0xff] %v40_v9  ;;  %43 = vst [vmem:[#allocation7 + $0x8] sm:$0xff] %v41_v10 }
  0x18   :  { %92 = shalt.err (!%p89_p9)
}
  0x19   :  { %53 = dma.vmem_to_hbm [thread:$0]  %s51_s19, 256, %s139_s3, [#allocation6]  }
  0x1a   :  { %103 = dma.done.wait [#allocation6], 256  }
  0x1b   :  { %104 = vsyncadd [#allocation6], 4294967040 }
  0x1c   :  { %57 = vsyncpa [#allocation5], 1 }
  0x1d   :  { %58 = vsyncpa [#allocation6], 1 }

</bundles_post_ra>
